<compile_context>
chip_gen: v7x
topology: tpu7x:2x2x1
jax: 0.10.0
libtpu: 0.0.40
codegen_flags: <defaults>
</compile_context>

<pallas_src>
import functools

import jax
import jax.numpy as jnp
import numpy as np
from jax.experimental import pallas as pl
from jax.experimental.pallas import tpu as pltpu


# -----------------------------------------------------------------------------
# Pallas kernel: masked BCE-with-logits over one [ti, tj] affinity tile,
# accumulating (pos_num, pos_den, tot_num, tot_den) per batch.
# -----------------------------------------------------------------------------
def _grouping_tile_kernel(pc_ref, pr_ref, logits_ref, out_ref, *, tau):
    i = pl.program_id(1)
    j = pl.program_id(2)

    # Per-batch accumulator lives in the (1, 8, 128) output block, which is
    # resident across the (i, j) reduction axes.  Zero it on the first tile.
    @pl.when((i == 0) & (j == 0))
    def _init():
        out_ref[...] = jnp.zeros_like(out_ref)

    pc = pc_ref[...]                                   # (1, ti, 1)  f32
    pr = pr_ref[...]                                   # (1, 1, tj)  f32
    z = logits_ref[...].astype(jnp.float32) * (1.0 / tau)   # (1, ti, tj)

    aff = pc == pr                                     # gt affinity target
    mask = (pc != 0.0) & (pr != 0.0)                   # valid-pair mask
    pos = mask & aff

    # BCEWithLogitsLoss(reduction='none'), y ∈ {0,1}:
    #   loss = max(z,0) - z*y + log(1 + exp(-|z|))
    pointwise = (jnp.maximum(z, 0.0) - jnp.where(aff, z, 0.0)
                 + jnp.log(1.0 + jnp.exp(-jnp.abs(z))))

    pos_num = jnp.sum(jnp.where(pos, pointwise, 0.0))
    tot_num = jnp.sum(jnp.where(mask, pointwise, 0.0))
    pos_den = jnp.sum(pos.astype(jnp.float32))
    tot_den = jnp.sum(mask.astype(jnp.float32))

    # Pack the 4 scalars onto sublane rows 0..3 (lane-dense (1,8,128) tile).
    sub = jax.lax.broadcasted_iota(jnp.int32, out_ref.shape, 1)
    inc = jnp.where(sub == 0, pos_num,
          jnp.where(sub == 1, pos_den,
          jnp.where(sub == 2, tot_num,
          jnp.where(sub == 3, tot_den, 0.0))))
    out_ref[...] = out_ref[...] + inc


def _pick_tile(n, target, align):
    """Largest aligned divisor of n that is <= target (or n itself)."""
    if n <= target:
        return n
    t = (target // align) * align
    while t >= align:
        if n % t == 0:
            return t
        t -= align
    return n  # fallback: whole axis (may be large; fine for moderate N)


def paragraph_grouping_loss(input_masks, input_grouping, target_masks,
                            target_grouping, matched_mask, *, tau=0.3, eps=1e-6):
    """JAX/Pallas equivalent of ParagraphGroupingLoss.forward."""
    inp_pos_idx, tgt_pos_idx, _neg_idx = matched_mask
    b, n = input_masks.shape[:2]
    del target_masks  # unused by the reference computation

    tg1 = target_grouping.astype(jnp.float32) + 1.0            # [B, K] (K == N)
    has_group = (jnp.sum(tg1, axis=1) > 0.0).astype(jnp.float32)  # [B]

    # pred_label_gt = einsum('bij,bj->bi', matching, tg1) with one-hot
    # matching[b, i_inp, j_tgt] = 1  ==  a tiny [B, N] scatter-add (data
    # dependent, so it stays in JAX glue; no dense [B,N,N] matrix is built).
    gathered = tg1[tgt_pos_idx[0], tgt_pos_idx[1]]
    pred = jnp.zeros((b, n), jnp.float32).at[inp_pos_idx[0], inp_pos_idx[1]].add(gathered)

    # Fold has_group into pred: zeroing pred where has_group == 0 flips
    # gt_affinity there, but the mask is identically zero for those batches,
    # so the loss is unchanged (exactly matches the reference).
    pred = pred * has_group[:, None]
    pred_col = pred[:, :, None]                                 # [B, N, 1]
    pred_row = pred[:, None, :]                                 # [B, 1, N]

    ti = _pick_tile(n, 512, 8)
    tj = _pick_tile(n, 512, 128)
    grid = (b, n // ti, n // tj)

    kernel = functools.partial(_grouping_tile_kernel, tau=float(tau))
    partials = pl.pallas_call(
        kernel,
        out_shape=jax.ShapeDtypeStruct((b, 8, 128), jnp.float32),
        grid_spec=pltpu.PrefetchScalarGridSpec(
            num_scalar_prefetch=0,
            grid=grid,
            in_specs=[
                pl.BlockSpec((1, ti, 1), lambda bi, i, j: (bi, i, 0)),
                pl.BlockSpec((1, 1, tj), lambda bi, i, j: (bi, 0, j)),
                pl.BlockSpec((1, ti, tj), lambda bi, i, j: (bi, i, j)),
            ],
            out_specs=pl.BlockSpec((1, 8, 128), lambda bi, i, j: (bi, 0, 0)),
        ),
        compiler_params=pltpu.CompilerParams(
            dimension_semantics=("parallel", "arbitrary", "arbitrary")),
    )(pred_col, pred_row, input_grouping)

    # Finalize globally (reference sums over the whole flattened batch).
    pos_num = jnp.sum(partials[:, 0, 0])
    pos_den = jnp.sum(partials[:, 1, 0])
    tot_num = jnp.sum(partials[:, 2, 0])
    tot_den = jnp.sum(partials[:, 3, 0])
    neg_num = tot_num - pos_num
    neg_den = tot_den - pos_den
    pos_loss = pos_num / (pos_den + eps)
    neg_loss = neg_num / (neg_den + eps)
    return 0.25 * pos_loss + 0.75 * neg_loss


# -----------------------------------------------------------------------------
# UnifiedDetectorLoss wrapper
# -----------------------------------------------------------------------------
class UnifiedDetectorLoss:
    def __init__(self, pq_loss_weight=3, instance_loss_weight=1,
                 maskid_loss_weight=0.0001, semantic_loss_weight=1,
                 grouping_loss_weight=1, alpha=0.75, tau=0.3, eps=1e-6, gamma=2.0):
        self.pqw = pq_loss_weight
        self.idw = instance_loss_weight
        self.miw = maskid_loss_weight
        self.ssw = semantic_loss_weight
        self.grw = grouping_loss_weight
        self.tau = tau
        self.eps = eps

    def __call__(self, input_tuple, target_tuple, matched_mask):
        input_masks, input_classes, input_ss, input_grouping, mask_feature, cls = input_tuple
        gt_masks, gt_classes, gt_ss, gt_grouping, target_sizes = target_tuple

        # TODO(synk): PQLoss, InstanceDiscLoss, MaskIDLoss, SemanticSegmentationLoss
        # are not defined in the provided reference; their contributions are set to
        # 0 and `matched_mask` (normally produced by PQLoss) is supplied externally.
        pq = jnp.float32(0.0)
        instdisc = jnp.float32(0.0)
        maskid = jnp.float32(0.0)
        semantic = jnp.float32(0.0)

        grouping = paragraph_grouping_loss(
            input_masks, input_grouping, gt_masks, gt_grouping, matched_mask,
            tau=self.tau, eps=self.eps)

        total = (self.pqw * pq + self.ssw * semantic + self.miw * maskid
                 + self.idw * instdisc + self.grw * grouping)
        loss_items = {
            "pq": float(pq), "semantic": float(semantic), "maskid": float(maskid),
            "instdisc": float(instdisc), "grouping": float(grouping),
        }
        return total, loss_items


# -----------------------------------------------------------------------------
# Pure-JAX reference (mirrors the PyTorch math) for a correctness check
# -----------------------------------------------------------------------------
def _grouping_loss_ref(input_masks, input_grouping, target_grouping, matched_mask,
                       tau=0.3, eps=1e-6):
    inp_pos_idx, tgt_pos_idx, _ = matched_mask
    b, n = input_masks.shape[:2]
    has_group = (jnp.sum(target_grouping + 1.0, axis=1) > 0).astype(jnp.float32)
    matching = jnp.zeros((b, n, n), jnp.float32)
    matching = matching.at[inp_pos_idx[0], inp_pos_idx[1], tgt_pos_idx[1]].set(1.0)
    pred = jnp.einsum("bij,bj->bi", matching, target_grouping + 1.0)
    gt_aff = (pred[:, :, None] == pred[:, None, :]).astype(jnp.float32)
    mask = (has_group[:, None, None] * pred[:, :, None] * pred[:, None, :] != 0.0
            ).astype(jnp.float32)
    z = input_grouping / tau
    ptl = jnp.maximum(z, 0.0) - z * gt_aff + jnp.log(1.0 + jnp.exp(-jnp.abs(z)))
    pos_mask = mask * gt_aff
    neg_mask = mask * (1.0 - gt_aff)
    pos = jnp.sum(ptl * pos_mask) / (jnp.sum(pos_mask) + eps)
    neg = jnp.sum(ptl * neg_mask) / (jnp.sum(neg_mask) + eps)
    return 0.25 * pos + 0.75 * neg


if __name__ == "__main__":
    key = jax.random.PRNGKey(0)
    B, N, K, H, W, C, S = 2, 8, 8, 16, 16, 3, 32   # small synthetic shapes

    k1, k2, k3, k4, k5, k6, k7 = jax.random.split(key, 7)
    input_masks = jax.random.normal(k1, (B, N, H, W), jnp.float32)
    input_classes = jax.random.normal(k2, (B, N, C), jnp.float32)
    input_ss = jax.random.normal(k3, (B, 2, H, W), jnp.float32)
    input_grouping = jax.random.normal(k4, (B, N, N), jnp.float32)
    mask_feature = jax.random.normal(k5, (B, S, H, W), jnp.float32)
    cls = jax.random.normal(k6, (B, N, C), jnp.float32)

    gt_masks = jax.random.normal(k7, (B, K, H, W), jnp.float32)
    gt_classes = jnp.zeros((B, K), jnp.int32)
    gt_ss = jnp.zeros((B, H, W), jnp.int32)
    gt_grouping = jnp.array(
        [[0.0, 1.0, 1.0, -1.0, 2.0, -1.0, -1.0, -1.0],
         [2.0, 0.0, 1.0, -1.0, -1.0, -1.0, -1.0, -1.0]], jnp.float32)
    target_sizes = jnp.array([5, 3], jnp.int32)

    # Synthetic matcher output (normally produced by PQLoss):
    batch_idx = jnp.array([0, 0, 0, 1, 1, 1], jnp.int32)
    inp_pos_idx = (batch_idx, jnp.array([0, 2, 4, 1, 3, 5], jnp.int32))
    tgt_pos_idx = (batch_idx, jnp.array([0, 1, 2, 0, 1, 2], jnp.int32))
    neg_idx = (jnp.array([0, 1], jnp.int32), jnp.array([7, 7], jnp.int32))
    matched_mask = (inp_pos_idx, tgt_pos_idx, neg_idx)

    input_tuple = (input_masks, input_classes, input_ss, input_grouping, mask_feature, cls)
    target_tuple = (gt_masks, gt_classes, gt_ss, gt_grouping, target_sizes)

    loss_fn = UnifiedDetectorLoss()
    total_loss, loss_items = loss_fn(input_tuple, target_tuple, matched_mask)
    total_loss = jax.block_until_ready(total_loss)

    ref = jax.block_until_ready(
        _grouping_loss_ref(input_masks, input_grouping, gt_grouping, matched_mask))

    np.testing.assert_allclose(np.asarray(total_loss), np.asarray(ref),
                               rtol=1e-5, atol=1e-5)
    print("KERNEL_OK")
</pallas_src>

<mosaic_0001>
module attributes {stable_mosaic.version = 11 : i64} {
  func.func @_grouping_tile_kernel(%arg0: i32, %arg1: i32, %arg2: i32, %arg3: memref<1x8x1xf32, #tpu.memory_space<vmem>>, %arg4: memref<1x1x8xf32, #tpu.memory_space<vmem>>, %arg5: memref<1x8x8xf32, #tpu.memory_space<vmem>>, %arg6: memref<1x8x128xf32, #tpu.memory_space<vmem>>) attributes {dimension_semantics = [#tpu.dimension_semantics<parallel>, #tpu.dimension_semantics<arbitrary>, #tpu.dimension_semantics<arbitrary>], iteration_bounds = array<i64: 2, 1, 1>, scalar_prefetch = 0 : i64, scratch_operands = 0 : i64, tpu.core_type = #tpu.core_type<tc>, window_params = [{transform_indices = @transform_0, window_bounds = array<i64: 1, 8, 1>}, {transform_indices = @transform_1, window_bounds = array<i64: 1, 1, 8>}, {transform_indices = @transform_2, window_bounds = array<i64: 1, 8, 8>}, {transform_indices = @transform_3, window_bounds = array<i64: 1, 8, 128>}]} {
    %c0_i32 = arith.constant 0 : i32
    %0 = arith.cmpi eq, %arg1, %c0_i32 : i32
    %c0_i32_0 = arith.constant 0 : i32
    %1 = arith.cmpi eq, %arg2, %c0_i32_0 : i32
    %2 = arith.andi %0, %1 : i1
    %3 = arith.extui %2 : i1 to i32
    %c0_i32_1 = arith.constant 0 : i32
    %4 = arith.cmpi ne, %3, %c0_i32_1 : i32
    scf.if %4 {
      %cst_30 = arith.constant 0.000000e+00 : f32
      %79 = vector.broadcast %cst_30 : f32 to vector<1x8x128xf32>
      %c0_31 = arith.constant 0 : index
      %c0_32 = arith.constant 0 : index
      %c0_33 = arith.constant 0 : index
      %80 = vector.load %arg6[%c0_31, %c0_32, %c0_33] : memref<1x8x128xf32, #tpu.memory_space<vmem>>, vector<1x8x128xf32>
      tpu.vector_store %arg6[%c0_31, %c0_32, %c0_33], %79 {strides = array<i32>} : memref<1x8x128xf32, #tpu.memory_space<vmem>>, vector<1x8x128xf32>,
    } else {
    }
    %c0 = arith.constant 0 : index
    %c0_2 = arith.constant 0 : index
    %c0_3 = arith.constant 0 : index
    %5 = vector.load %arg3[%c0, %c0_2, %c0_3] : memref<1x8x1xf32, #tpu.memory_space<vmem>>, vector<1x8x1xf32>
    %c0_4 = arith.constant 0 : index
    %c0_5 = arith.constant 0 : index
    %c0_6 = arith.constant 0 : index
    %6 = vector.load %arg4[%c0_4, %c0_5, %c0_6] : memref<1x1x8xf32, #tpu.memory_space<vmem>>, vector<1x1x8xf32>
    %c0_7 = arith.constant 0 : index
    %c0_8 = arith.constant 0 : index
    %c0_9 = arith.constant 0 : index
    %7 = vector.load %arg5[%c0_7, %c0_8, %c0_9] : memref<1x8x8xf32, #tpu.memory_space<vmem>>, vector<1x8x8xf32>
    %cst = arith.constant 3.33333325 : f32
    %8 = vector.broadcast %cst : f32 to vector<1x8x8xf32>
    %9 = arith.mulf %7, %8 : vector<1x8x8xf32>
    %10 = vector.broadcast %5 : vector<1x8x1xf32> to vector<1x8x8xf32>
    %11 = vector.broadcast %6 : vector<1x1x8xf32> to vector<1x8x8xf32>
    %12 = arith.cmpf oeq, %10, %11 : vector<1x8x8xf32>
    %cst_10 = arith.constant 0.000000e+00 : f32
    %13 = vector.broadcast %cst_10 : f32 to vector<1x8x1xf32>
    %14 = arith.cmpf one, %5, %13 : vector<1x8x1xf32>
    %cst_11 = arith.constant 0.000000e+00 : f32
    %15 = vector.broadcast %cst_11 : f32 to vector<1x1x8xf32>
    %16 = arith.cmpf one, %6, %15 : vector<1x1x8xf32>
    %17 = vector.broadcast %14 : vector<1x8x1xi1> to vector<1x8x8xi1>
    %18 = vector.broadcast %16 : vector<1x1x8xi1> to vector<1x8x8xi1>
    %19 = arith.andi %17, %18 : vector<1x8x8xi1>
    %20 = arith.andi %19, %12 : vector<1x8x8xi1>
    %cst_12 = arith.constant 0.000000e+00 : f32
    %21 = vector.broadcast %cst_12 : f32 to vector<1x8x8xf32>
    %22 = arith.maximumf %9, %21 : vector<1x8x8xf32>
    %cst_13 = arith.constant 0.000000e+00 : f32
    %23 = vector.broadcast %cst_13 : f32 to vector<1x8x8xf32>
    %24 = arith.select %12, %9, %23 : vector<1x8x8xi1>, vector<1x8x8xf32>
    %25 = arith.subf %22, %24 : vector<1x8x8xf32>
    %26 = math.absf %9 : vector<1x8x8xf32>
    %cst_14 = arith.constant 0.000000e+00 : f32
    %27 = vector.broadcast %cst_14 : f32 to vector<1x8x8xf32>
    %28 = arith.subf %27, %26 : vector<1x8x8xf32>
    %29 = math.exp %28 : vector<1x8x8xf32>
    %cst_15 = arith.constant 1.000000e+00 : f32
    %30 = vector.broadcast %cst_15 : f32 to vector<1x8x8xf32>
    %31 = arith.addf %30, %29 : vector<1x8x8xf32>
    %32 = math.log %31 : vector<1x8x8xf32>
    %33 = arith.addf %25, %32 : vector<1x8x8xf32>
    %cst_16 = arith.constant 0.000000e+00 : f32
    %34 = vector.broadcast %cst_16 : f32 to vector<1x8x8xf32>
    %35 = arith.select %20, %33, %34 : vector<1x8x8xi1>, vector<1x8x8xf32>
    %36 = vector.shape_cast %35 : vector<1x8x8xf32> to vector<1x1x8x8xf32>
    %cst_17 = arith.constant dense<0.000000e+00> : vector<1xf32>
    %37 = vector.multi_reduction <add>, %36, %cst_17 [1, 2, 3] : vector<1x1x8x8xf32> to vector<1xf32>
    %38 = vector.shape_cast %37 : vector<1xf32> to vector<1x1x1x1xf32>
    %39 = vector.extract %38[0, 0, 0, 0] : f32 from vector<1x1x1x1xf32>
    %cst_18 = arith.constant 0.000000e+00 : f32
    %40 = vector.broadcast %cst_18 : f32 to vector<1x8x8xf32>
    %41 = arith.select %19, %33, %40 : vector<1x8x8xi1>, vector<1x8x8xf32>
    %42 = vector.shape_cast %41 : vector<1x8x8xf32> to vector<1x1x8x8xf32>
    %cst_19 = arith.constant dense<0.000000e+00> : vector<1xf32>
    %43 = vector.multi_reduction <add>, %42, %cst_19 [1, 2, 3] : vector<1x1x8x8xf32> to vector<1xf32>
    %44 = vector.shape_cast %43 : vector<1xf32> to vector<1x1x1x1xf32>
    %45 = vector.extract %44[0, 0, 0, 0] : f32 from vector<1x1x1x1xf32>
    %46 = arith.extui %20 : vector<1x8x8xi1> to vector<1x8x8xi32>
    %47 = arith.sitofp %46 : vector<1x8x8xi32> to vector<1x8x8xf32>
    %48 = vector.shape_cast %47 : vector<1x8x8xf32> to vector<1x1x8x8xf32>
    %cst_20 = arith.constant dense<0.000000e+00> : vector<1xf32>
    %49 = vector.multi_reduction <add>, %48, %cst_20 [1, 2, 3] : vector<1x1x8x8xf32> to vector<1xf32>
    %50 = vector.shape_cast %49 : vector<1xf32> to vector<1x1x1x1xf32>
    %51 = vector.extract %50[0, 0, 0, 0] : f32 from vector<1x1x1x1xf32>
    %52 = arith.extui %19 : vector<1x8x8xi1> to vector<1x8x8xi32>
    %53 = arith.sitofp %52 : vector<1x8x8xi32> to vector<1x8x8xf32>
    %54 = vector.shape_cast %53 : vector<1x8x8xf32> to vector<1x1x8x8xf32>
    %cst_21 = arith.constant dense<0.000000e+00> : vector<1xf32>
    %55 = vector.multi_reduction <add>, %54, %cst_21 [1, 2, 3] : vector<1x1x8x8xf32> to vector<1xf32>
    %56 = vector.shape_cast %55 : vector<1xf32> to vector<1x1x1x1xf32>
    %57 = vector.extract %56[0, 0, 0, 0] : f32 from vector<1x1x1x1xf32>
    %58 = tpu.iota {dimensions = array<i32: 1>} : vector<1x8x128xi32>
    %c0_i32_22 = arith.constant 0 : i32
    %59 = vector.broadcast %c0_i32_22 : i32 to vector<1x8x128xi32>
    %60 = arith.cmpi eq, %58, %59 : vector<1x8x128xi32>
    %c1_i32 = arith.constant 1 : i32
    %61 = vector.broadcast %c1_i32 : i32 to vector<1x8x128xi32>
    %62 = arith.cmpi eq, %58, %61 : vector<1x8x128xi32>
    %c2_i32 = arith.constant 2 : i32
    %63 = vector.broadcast %c2_i32 : i32 to vector<1x8x128xi32>
    %64 = arith.cmpi eq, %58, %63 : vector<1x8x128xi32>
    %c3_i32 = arith.constant 3 : i32
    %65 = vector.broadcast %c3_i32 : i32 to vector<1x8x128xi32>
    %66 = arith.cmpi eq, %58, %65 : vector<1x8x128xi32>
    %cst_23 = arith.constant 0.000000e+00 : f32
    %67 = vector.broadcast %57 : f32 to vector<1x8x128xf32>
    %68 = vector.broadcast %cst_23 : f32 to vector<1x8x128xf32>
    %69 = arith.select %66, %67, %68 : vector<1x8x128xi1>, vector<1x8x128xf32>
    %70 = vector.broadcast %45 : f32 to vector<1x8x128xf32>
    %71 = arith.select %64, %70, %69 : vector<1x8x128xi1>, vector<1x8x128xf32>
    %72 = vector.broadcast %51 : f32 to vector<1x8x128xf32>
    %73 = arith.select %62, %72, %71 : vector<1x8x128xi1>, vector<1x8x128xf32>
    %74 = vector.broadcast %39 : f32 to vector<1x8x128xf32>
    %75 = arith.select %60, %74, %73 : vector<1x8x128xi1>, vector<1x8x128xf32>
    %c0_24 = arith.constant 0 : index
    %c0_25 = arith.constant 0 : index
    %c0_26 = arith.constant 0 : index
    %76 = vector.load %arg6[%c0_24, %c0_25, %c0_26] : memref<1x8x128xf32, #tpu.memory_space<vmem>>, vector<1x8x128xf32>
    %77 = arith.addf %76, %75 : vector<1x8x128xf32>
    %c0_27 = arith.constant 0 : index
    %c0_28 = arith.constant 0 : index
    %c0_29 = arith.constant 0 : index
    %78 = vector.load %arg6[%c0_27, %c0_28, %c0_29] : memref<1x8x128xf32, #tpu.memory_space<vmem>>, vector<1x8x128xf32>
    tpu.vector_store %arg6[%c0_27, %c0_28, %c0_29], %77 {strides = array<i32>} : memref<1x8x128xf32, #tpu.memory_space<vmem>>, vector<1x8x128xf32>,
    return
  }
  func.func @transform_0(%arg0: i32, %arg1: i32, %arg2: i32) -> (i32, i32, i32) {
    %c0_i32 = arith.constant 0 : i32
    %c0_i32_0 = arith.constant 0 : i32
    return %arg0, %arg1, %c0_i32 : i32, i32, i32
  }
  func.func @transform_1(%arg0: i32, %arg1: i32, %arg2: i32) -> (i32, i32, i32) {
    %c0_i32 = arith.constant 0 : i32
    %c0_i32_0 = arith.constant 0 : i32
    return %arg0, %c0_i32, %arg2 : i32, i32, i32
  }
  func.func @transform_2(%arg0: i32, %arg1: i32, %arg2: i32) -> (i32, i32, i32) {
    %c0_i32 = arith.constant 0 : i32
    return %arg0, %arg1, %arg2 : i32, i32, i32
  }
  func.func @transform_3(%arg0: i32, %arg1: i32, %arg2: i32) -> (i32, i32, i32) {
    %c0_i32 = arith.constant 0 : i32
    %c0_i32_0 = arith.constant 0 : i32
    %c0_i32_1 = arith.constant 0 : i32
    return %arg0, %c0_i32, %c0_i32_0 : i32, i32, i32
  }
}

</mosaic_0001>

<bundles_post_ra>
// kernel: tpu_custom_call.1
= control target key start
LH: loop header
LB: loop body
LE: loop exit
PB: predicated region body
PF: predicated region fallthrough
CT: control target
= control target key end

     0   :  { %8 = vsyncpa [#allocation3], 0  ;;  %s802_s0 = inlined_call_operand.vmem [shape: f32[2,8,1], index: 0, kind: input, shape index: {}]   ;;  %s803_s1 = inlined_call_operand.vmem [shape: f32[2,1,8], index: 1, kind: input, shape index: {}]   ;;  %s804_s2 = inlined_call_operand.vmem [shape: f32[2,8,8], index: 2, kind: input, shape index: {}]   ;;  %s805_s3 = inlined_call_operand.hbm [shape: f32[2,8,128], index: 3, kind: output, shape index: {}]  }
   0x1   :  { %10 = vsyncpa [#allocation3 + $0x1], 0  ;;  %s677_s12 = smov 0   ;;  %s679_s13 = smov 0  }
   0x2   :  { %s681_s14 = smov 0   ;;  %s683_s15 = smov 0  }
   0x3   :  { %s685_s16 = smov 0   ;;  %s687_s17 = smov 0  }
   0x4 LB: > { %s490_s18 = sadd.s32 4294967295, %s652_s17   ;;  %s491_s19 = sadd.s32 4294967294, %s652_s17   ;;  %s652_s17 = sphi %s687_s17, %s16_s17   ;;  %s648_s16 = sphi %s685_s16, %s812_s16   ;;  %s644_s15 = sphi %s683_s15, %s811_s15   ;;  %s640_s14 = sphi %s681_s14, %s810_s14   ;;  %s636_s13 = sphi %s679_s13, %s809_s13   ;;  %s632_s12 = sphi %s677_s12, %s808_s12  }
   0x5   : > { %s35_s20 = sadd.s32 1, %s648_s16  ;;  %s128_s21 = sadd.s32 1, %s640_s14 }
   0x6   : > { %p37_p0 = scmp.ge.s32.totalorder %s35_s20, 2  ;;  %p138_p1 = scmp.ne.s32.totalorder %s640_s14, %s636_s13 }
   0x7   : > { %p139_p2 = scmp.eq.s32.totalorder %s490_s18, 1  ;;  %p144_p3 = scmp.ne.s32.totalorder %s636_s13, %s632_s12 }
   0x8   : > { %s814_s20 = smov (%p37_p0, %s35_s20), 0  ;;  %p145_p5 = scmp.eq.s32.totalorder %s491_s19, 1 }
   0x9   : > { %p717_p4 = por %p139_p2, %p138_p1  ;;  %s125_s23 = ssub.s32 %s648_s16, %s814_s20 }
   0xa   : > { %p494_p6 = scmp.ge.s32.totalorder %s652_s17, 1  ;;  %p126_p7 = scmp.eq.s32.totalorder %s125_s23, 0 }
   0xb   : > { %p724_p8 = por %p145_p5, %p144_p3  ;;  %p195_p9 = scmp.lt.s32.totalorder %s652_s17, 3 }
   0xc   : > { %s730_s25 = scalar_select %p126_p7, %s640_s14, %s128_s21  }
   0xd   : > { %p196_p10 = pnand %p494_p6, %p195_p9 }
   0xe   : > { %p237_p11 = scmp.lt.s32.totalorder (!%p196_p10), %s644_s15, 1  ;;  %v654_v0 = vmov (!%p196_p10), 0   ;;  %v277_v12 = vlaneseq (!%p196_p10)  ;;  %vm310_vm6 = vcmask (!%p196_p10), 64512   ;;  %v655_v26 = vmov (!%p196_p10), 0.0   ;;  %s234_s10 = sand.u32 (!%p196_p10), 1, %s636_s13  }
   0xf   : > { %199 = sbr.rel (%p196_p10) target bundleno = 395 (0x18b), region = 32  ;;  %569 = vset.pattern.permute.xlu0 (!%p196_p10), %v654_v0  ;;  %s495_s19 = sshll.u32 (!%p196_p10), %s234_s10, 3 }
  0x10   : > { %v743_v13 = vshrl.u32 (!%p196_p10), %v277_v12, 7  ;;  %s374_s5 = scalar_lea.sflag (!%p196_p10), [#allocation3], %s234_s10 }
  0x12   : > { %v279_v14 = vsub.s32 (!%p196_p10), 0, %v743_v13  ;;  %vm361_vm8 = vcmp.eq.s32.totalorder (!%p196_p10), %v743_v13, 3  ;;  %vm360_vm9 = vcmp.eq.s32.totalorder (!%p196_p10), %v743_v13, 2  ;;  %vm359_vm10 = vcmp.eq.s32.totalorder (!%p196_p10), %v743_v13, 1 }
  0x13   : > { %vm358_vm11 = vcmp.eq.s32.totalorder (!%p196_p10), %v743_v13, 0 }
  0x16   : > { %s238_s26 = scalar_select %p237_p11, %s644_s15, 1 }
  0x18   : > { %s496_s27 = sshll.u32 %s238_s26, 3  ;;  %s249_s30 = scalar_lea.vmem %s803_s1, %s238_s26 }
  0x19   : > { %s243_s6 = scalar_lea.vmem %s802_s0, %s496_s27  ;;  %v268_v1 = vld [vmem:[%s249_s30] sm:$0x1]  ;;  %s259_s9 = scalar_lea.vmem %s804_s2, %s496_s27 }
  0x1a   : > { %v267_v2 = vld [vmem:[%s243_s6] sm:$0xff]  ;;  %vm284_vm0 = vcmp.ne.f32.partialorder %v268_v1, 0.0  ;;  %v280_v15 = vrot.slane %v268_v1, %v279_v14  ;;  %s501_s26 = sshll.u32 %s644_s15, 7  ;;  %s236_s27 = scalar_lea.vmem [#allocation2], %s495_s19 }
  0x1b   : > { %273 = vperm.xlu0 %569, %v267_v2   ;;  %vm283_vm1 = vcmp.ne.f32.partialorder %v267_v2, 0.0  ;;  %v290_v4 = vsel %vm284_vm0, 1, %v654_v0  ;;  %v269_v5 = vld [vmem:[%s259_s9] sm:$0xff]  ;;  %s387_s28 = sshll.u32 %s236_s27, 4  ;;  %s755_s4 = scalar_lea.hbm %s805_s3, %s501_s26  ;;  %s757_s28 = int_to_ptr.vmem [resolvable:$true] %s387_s28 }
  0x1c   : > { %v285_v3 = vsel %vm283_vm1, 1, %v654_v0  ;;  %v270_v6 = vmul.f32 3.3333333, %v269_v5  ;;  %v294_v18 = vrot.slane %v290_v4, %v279_v14  ;;  %s574_s6 = scalar_lea.vmem %s757_s28, 128  ;;  %s656_s15 = smov [#allocation2]  }
  0x1d   : > { %p575_p12 = scmp.ne.s32.totalorder %s757_s28, %s574_s6  ;;  %s578_s7 = sshll.u32 %s656_s15, 4  ;;  %s579_s7 = int_to_ptr.vmem [resolvable:$false] %s578_s7 }
  0x1e   : > { %v301_v7 = vand.u32 2147483647, %v270_v6  ;;  %v298_v17 = vmax.f32 %v270_v6, 0.0  ;;  %vm295_vm3 = vcmp.eq.s32.totalorder %v294_v18, 1  ;;  %s580_s8 = scalar_lea.vmem %s579_s7, 256  ;;  %p581_p1 = scmp.lt.s32.totalorder %s757_s28, %s579_s7 }
  0x1f   : > { %287 = vperm.xlu0 %569, %v285_v3   ;;  %p576_p13 = pnand %p575_p12, %p717_p4  ;;  %p582_p2 = scmp.lt.s32.totalorder %s580_s8, %s574_s6 }
  0x20   : > { %v302_v8 = vsub.f32 0.0, %v301_v7 }
  0x21   : > { %p577_p0 = pneg %p576_p13  ;;  %p583_p3 = por %p582_p2, %p581_p1 }
  0x22   : > { %v303_v9 = vmul.f32 1.442695, %v302_v8 }
  0x23   : > { %p584_p5 = pnand %p583_p3, %p577_p0 }
  0x24   : > { %570 = vpow2.f32 %v303_v9 }
  0x2e   : > { %v571_v10 = vpop.eup %570 }
  0x2f   : > { %v305_v11 = vadd.f32 1.0, %v571_v10 }
  0x31   : > { %572 = vlog2.f32 %v305_v11 }
  0x3b   : > { %v573_v16 = vpop.eup %572 }
  0x3c   : > { %v307_v20 = vmul.f32 0.6931472, %v573_v16 }
  0x9a   : > { %v274_v19 = vpop.permute.xlu0 %273 }
  0x9b   : > { %vm282_vm2 = vcmp.eq.f32.partialorder %v274_v19, %v280_v15 }
  0x9c   : > { %v299_v21 = vsel %vm282_vm2, %v270_v6, 0.0 }
  0x9d   : > { %v300_v22 = vsub.f32 %v298_v17, %v299_v21 }
  0x9e   : > { %v288_v23 = vpop.permute.xlu0 %287 }
  0x9f   : > { %vm289_vm4 = vcmp.eq.s32.totalorder %v288_v23, 1  ;;  %v308_v24 = vadd.f32 %v307_v20, %v300_v22 }
  0xa0   : > { %vm296_vm5 = vmand %vm289_vm4, %vm295_vm3 }
  0xa1   : > { %vm297_vm7 = vmand %vm296_vm5, %vm282_vm2  ;;  %v321_v25 = vsel %vm296_vm5, %v308_v24, 0.0  ;;  %v499_v32 = vsel %vm296_vm5, 1.0, %v655_v26 }
  0xa2   : > { %v498_v27 = vsel %vm297_vm7, 1.0, %v655_v26  ;;  %v309_v28 = vsel %vm297_vm7, %v308_v24, 0.0  ;;  %v322_v31 = vsel %vm310_vm6, %v321_v25, 0.0  ;;  %v346_v33 = vsel %vm310_vm6, %v499_v32, 0.0 }
  0xa3   : > { %v334_v29 = vsel %vm310_vm6, %v498_v27, 0.0  ;;  %v311_v30 = vsel %vm310_vm6, %v309_v28, 0.0 }
  0xa4   : > { %335 = vadd.xlane.f32.xlu0 %v334_v29  ;;  %312 = vadd.xlane.f32.xlu1 %v311_v30 }
  0xa8   : > { %323 = vadd.xlane.f32.xlu1 %v322_v31 }
  0xac   : > { %347 = vadd.xlane.f32.xlu1 %v346_v33 }
 0x131   : > { %v336_v34 = vpop.xlane.xlu0 %335  ;;  %v313_v35 = vpop.xlane.xlu1 %312 }
 0x132   : > { %v337_v36 = vrot.slane %v336_v34, 4  ;;  %v314_v37 = vrot.slane %v313_v35, 4 }
 0x134   : > { %v338_v38 = vadd.f32 %v337_v36, %v336_v34  ;;  %v315_v39 = vadd.f32 %v314_v37, %v313_v35 }
 0x135   : > { %v324_v40 = vpop.xlane.xlu1 %323 }
 0x136   : > { %v339_v41 = vrot.slane %v338_v38, 2  ;;  %v316_v42 = vrot.slane %v315_v39, 2  ;;  %v325_v43 = vrot.slane %v324_v40, 4 }
 0x138   : > { %v326_v44 = vadd.f32 %v325_v43, %v324_v40  ;;  %v317_v45 = vadd.f32 %v316_v42, %v315_v39  ;;  %v340_v46 = vadd.f32 %v339_v41, %v338_v38 }
 0x139   : > { %v348_v47 = vpop.xlane.xlu1 %347 }
 0x13a   : > { %v327_v48 = vrot.slane %v326_v44, 2  ;;  %v349_v49 = vrot.slane %v348_v47, 4  ;;  %v318_v50 = vrot.slane %v317_v45, 1  ;;  %v341_v54 = vrot.slane %v340_v46, 1 }
 0x13c   : > { %v350_v51 = vadd.f32 %v349_v49, %v348_v47  ;;  %v319_v52 = vadd.f32 %v318_v50, %v317_v45  ;;  %v328_v53 = vadd.f32 %v327_v48, %v326_v44  ;;  %v342_v59 = vadd.f32 %v341_v54, %v340_v46 }
 0x13e   : > { %v351_v55 = vrot.slane %v350_v51, 2  ;;  %504 = vpush %v319_v52  ;;  %v329_v56 = vrot.slane %v328_v53, 1 }
 0x140   : > { %v352_v57 = vadd.f32 %v351_v55, %v350_v51  ;;  %v330_v58 = vadd.f32 %v329_v56, %v328_v53 }
 0x142   : > { %506 = vpush %v330_v58  ;;  %v353_v60 = vrot.slane %v352_v57, 1 }
 0x143   : > { %508 = vpush %v342_v59 }
 0x144   : > { %v354_v61 = vadd.f32 %v353_v60, %v352_v57 }
 0x146   : > { %510 = vpush %v354_v61 }
 0x16f   : > { %s505_s11 = spop %504 }
 0x170   : > { %v368_v3 = vstv %s505_s11 }
 0x173   : > { %s507_s18 = spop %506 }
 0x174   : > { %s509_s21 = spop %508  ;;  %v364_v63 = vstv %s507_s18 }
 0x175   : > { %v366_v1 = vstv %s509_s21 }
 0x177   : > { %s511_s23 = spop %510 }
 0x178   : > { %v362_v62 = vstv %s511_s23 }
 0x179   : > { %v363_v0 = vsel %vm361_vm8, %v362_v62, 0.0 }
 0x17a   : > { %v365_v2 = vsel %vm360_vm9, %v364_v63, %v363_v0 }
 0x17b   : > { %v367_v4 = vsel %vm359_vm10, %v366_v1, %v365_v2 }
 0x17c   : > { %v369_v5 = vsel %vm358_vm11, %v368_v3, %v367_v4 }
 0x17d   : > { %372 = vst [vmem:[%s236_s27] sm:$0xff] %v369_v5 }
 0x17e   : > { %587 = shalt.err (!%p584_p5)
}
 0x17f   : > { %s588_s9 = scalar_lea.hbm %s755_s4, 128  ;;  %s592_s18 = scalar_lea.hbm %s805_s3, 256 }
 0x180   : > { %p589_p6 = scmp.ne.s32.totalorder %s755_s4, %s588_s9  ;;  %p593_p10 = scmp.lt.u32.totalorder %s755_s4, %s805_s3 }
 0x181   : > { %p594_p11 = scmp.lt.u32.totalorder %s592_s18, %s588_s9  ;;  %p596_p13 = scmp.lt.u32.totalorder %s588_s9, %s755_s4 }
 0x182   : > { %p590_p7 = pnand %p589_p6, %p717_p4 }
 0x183   : > { %p595_p12 = por %p594_p11, %p593_p10 }
 0x184   : > { %p591_p9 = pneg %p590_p7 }
 0x185   : > { %p597_p0 = por %p596_p13, %p595_p12 }
 0x187   : > { %p598_p1 = pnand %p597_p0, %p591_p9 }
 0x189   : > { %601 = shalt.err (!%p598_p1)
}
 0x18a   : > { %512 = dma.vmem_to_hbm [thread:$0]  (%p717_p4), %s757_s28, 128, %s755_s4, %s374_s5  }
 0x18b PF: > { %p518_p2 = scmp.ge.s32.totalorder %s652_s17, 2  ;;  %s399_s23 = sand.u32 1, %s632_s12  }
 0x18c   : > { %s400_s26 = scalar_lea.sflag [#allocation3], %s399_s23 }
 0x18d   : > { %p515_p3 = pnand %p518_p2, %p724_p8 }
 0x18f   : > { %627 = dma.done.wait (!%p515_p3), %s400_s26, 128  }
 0x190   : > { %629 = vsyncadd (!%p515_p3), %s400_s26, 4294967168  ;;  %s16_s17 = sadd.s32 1, %s652_s17   ;;  %s808_s12 = smov %s636_s13 }
 0x191   : > { %p13_p5 = scmp.ge.s32.totalorder %s16_s17, 4   ;;  %s809_s13 = smov %s640_s14 }
 0x192   : > { %s810_s14 = smov %s730_s25  ;;  %s811_s15 = smov %s648_s16 }
 0x193   : > { %s812_s16 = smov %s814_s20  ;;  %15 = sbr.rel (!%p13_p5) target bundleno = 4 (0x4), region = 77 }
 0x19a   :  { %405 = vsyncpa [#allocation3], 1 }
 0x19b   :  { %407 = vsyncpa [#allocation3 + $0x1], 1 }

</bundles_post_ra>
